<compile_context>
chip_gen: v7x
topology: tpu7x:2x2x1
jax: 0.10.0
libtpu: 0.0.40
codegen_flags: <defaults>
</compile_context>

<pallas_src>
import jax
import jax.numpy as jnp
from jax.experimental import pallas as pl
from jax.experimental.pallas import tpu as pltpu

_LANES = 128  # lane-dense output width (num_labels padded up to this)


def _round_up(x, m):
    return (x + m - 1) // m * m


def _cdiv(a, b):
    return (a + b - 1) // b


def fused_head_kernel(x_ref, w_ref, b_ref, out_ref):
    """One fused matmul + bias + numerically-stable softmax over 128 lanes.

    x_ref:  (TB, H)     producer dtype (f32 or bf16)
    w_ref:  (H, 128)    same dtype as x, zero-padded past num_labels
    b_ref:  (1, 128)    f32; padded lanes hold -1e30 (vanish under exp)
    out_ref:(TB, 128)   probabilities (padded lanes ~ 0), out dtype
    """
    logits = jnp.dot(x_ref[...], w_ref[...],
                     preferred_element_type=jnp.float32) + b_ref[...]
    m = jnp.max(logits, axis=-1, keepdims=True)
    e = jnp.exp(logits - m)
    denom = jnp.sum(e, axis=-1, keepdims=True)
    # Exact divide: kernel is HBM-bound, the extra VPU work is free, and it
    # keeps sum(probs) == 1 to f32 precision (approx reciprocal did not).
    out_ref[...] = (e / denom).astype(out_ref.dtype)


def prepare_params(params, *, weight_dtype=jnp.float32):
    """One-time fold of linear38 -> (dropout: identity) -> linear8 -> linear3
    -> linearOutput into a single (H, 128)-padded weight + f32 bias.

        W_fused = W38 @ W8 @ W3 @ Wo
        b_fused = ((b38 @ W8 + b8) @ W3 + b3) @ Wo + bo

    Valid in eval/inference mode only.  Call once; reuse across batches.
    """
    (w38, b38, w8, b8, w3, b3, wo, bo) = params
    hidden = w38.shape[0]
    num_labels = wo.shape[1]
    assert num_labels <= _LANES, "kernel assumes num_labels <= 128"

    w_fused = w38 @ w8 @ w3 @ wo                        # (H, num_labels) f32
    b_fused = ((b38 @ w8 + b8) @ w3 + b3) @ wo + bo     # (1, num_labels) f32

    w_pad = (jnp.zeros((hidden, _LANES), jnp.float32)
             .at[:, :num_labels].set(w_fused)
             .astype(weight_dtype))
    # Padded lanes get -1e30 so exp() removes them from the softmax.
    # MUST stay f32: casting -1e30 to bf16/f16 overflows to -inf -> NaN risk.
    b_pad = (jnp.full((1, _LANES), -1e30, jnp.float32)
             .at[:, :num_labels].set(b_fused))
    return w_pad, b_pad, num_labels


def classifier_head(pooled_output, prepared, *, tb_max=1024, out_dtype=None,
                    vmem_budget_bytes=12 * 1024 * 1024):
    """Fused classifier head.  Returns (batch, num_labels) probabilities in
    `out_dtype` (defaults to the input dtype, e.g. bf16-in -> bf16-out)."""
    w_pad, b_pad, num_labels = prepared
    batch, hidden = pooled_output.shape
    x_dtype = jnp.dtype(pooled_output.dtype)
    out_dtype = x_dtype if out_dtype is None else jnp.dtype(out_dtype)

    # Sublane packing for the activation dtype.
    sub = 16 if x_dtype == jnp.dtype(jnp.bfloat16) else 8
    rows = _round_up(batch, sub)

    # v7x: aim for >= 2 grid steps so ("parallel",) shards across both TCs.
    tb = min(_round_up(tb_max, sub), _round_up(_cdiv(rows, 2), sub))

    # v5e guard: keep double-buffered x/out tiles + resident weight under the
    # 16 MiB default scoped-VMEM (v6e/v7x defaults are looser).
    def _vmem_bytes(t):
        return (2 * t * hidden * x_dtype.itemsize          # x double-buffer
                + 2 * t * _LANES * out_dtype.itemsize      # out double-buffer
                + 2 * hidden * _LANES * w_pad.dtype.itemsize
                + 2 * _LANES * 4)                          # bias
    while tb > sub and _vmem_bytes(tb) > vmem_budget_bytes:
        tb = _round_up(tb // 2, sub)

    grid = (_cdiv(batch, tb),)
    out = pl.pallas_call(
        fused_head_kernel,
        out_shape=jax.ShapeDtypeStruct((batch, _LANES), out_dtype),
        grid=grid,
        in_specs=[
            pl.BlockSpec((tb, hidden), lambda i: (i, 0)),       # x: batch tile
            pl.BlockSpec((hidden, _LANES), lambda i: (0, 0)),   # fused weight
            pl.BlockSpec((1, _LANES), lambda i: (0, 0)),        # fused bias
        ],
        out_specs=pl.BlockSpec((tb, _LANES), lambda i: (i, 0)),
        compiler_params=pltpu.CompilerParams(
            dimension_semantics=("parallel",)),                 # v7x: 2 TCs
    )(pooled_output, w_pad, b_pad)

    # Lane slice only (consumers that tolerate the padded 128-lane layout can
    # skip this and fuse it downstream).
    return out[:, :num_labels]


def init_params(key, hidden_size, num_labels):
    """Deterministic synthetic parameters (PyTorch Linear init, pre-transposed
    to (in, out) so the forward is x @ W + b)."""
    def linear(k, fan_in, fan_out):
        k1, k2 = jax.random.split(k)
        bound = 1.0 / jnp.sqrt(fan_in)
        w = jax.random.uniform(k1, (fan_in, fan_out), jnp.float32, -bound, bound)
        b = jax.random.uniform(k2, (1, fan_out), jnp.float32, -bound, bound)
        return w, b

    k38, k8, k3, ko = jax.random.split(key, 4)
    w38, b38 = linear(k38, hidden_size, 38)
    w8, b8 = linear(k8, 38, 8)
    w3, b3 = linear(k3, 8, 3)
    wo, bo = linear(ko, 3, num_labels)
    return (w38, b38, w8, b8, w3, b3, wo, bo)


def reference(pooled_output, params):
    """Pure-JAX reference of the original (unfused) forward pass (eval mode)."""
    (w38, b38, w8, b8, w3, b3, wo, bo) = params
    h = pooled_output @ w38 + b38          # linear38
    # dropout38: identity in eval mode
    h = h @ w8 + b8                        # linear8
    h = h @ w3 + b3                        # linear3
    logits = h @ wo + bo                   # linearOutput
    return jax.nn.softmax(logits, axis=-1)


if __name__ == "__main__":
    batch = 2
    hidden_size = 32     # small stand-in for bert.config.hidden_size
    num_labels = 3

    key = jax.random.PRNGKey(0)
    k_in, k_par = jax.random.split(key)

    # Stand-in for outputs.pooler_output from the (unimplemented) BERT backbone.
    pooled_output = jax.random.normal(k_in, (batch, hidden_size), jnp.float32)
    params = init_params(k_par, hidden_size, num_labels)

    ref = reference(pooled_output, params)

    # ---- f32 path: tight check (exact divide, no wrapper pad/cast) ----------
    prepared_f32 = prepare_params(params, weight_dtype=jnp.float32)
    probs = classifier_head(pooled_output, prepared_f32, out_dtype=jnp.float32)
    probs = jax.block_until_ready(probs)
    assert probs.shape == (batch, num_labels)
    assert jnp.allclose(probs, ref, atol=1e-3, rtol=1e-3)
    assert jnp.allclose(jnp.sum(probs, axis=-1), 1.0, atol=1e-3)

    # ---- bf16 producer path: backbone emits bf16 pooled_output directly -----
    # (stands in for a bf16 backbone; no per-call wrapper cast in classifier_head)
    pooled_bf16 = pooled_output.astype(jnp.bfloat16)
    prepared_bf16 = prepare_params(params, weight_dtype=jnp.bfloat16)
    probs_bf16 = classifier_head(pooled_bf16, prepared_bf16)   # bf16 in -> bf16 out
    probs_bf16 = jax.block_until_ready(probs_bf16)
    assert probs_bf16.shape == (batch, num_labels)
    assert probs_bf16.dtype == jnp.bfloat16
    ref_bf16 = reference(pooled_bf16.astype(jnp.float32), params)
    p32 = probs_bf16.astype(jnp.float32)
    assert jnp.allclose(p32, ref_bf16, atol=5e-2, rtol=5e-2)
    assert jnp.allclose(jnp.sum(p32, axis=-1), 1.0, atol=2e-2)

    print("KERNEL_OK")
</pallas_src>

<mosaic_0001>
module attributes {stable_mosaic.version = 11 : i64} {
  func.func @fused_head_kernel(%arg0: i32, %arg1: memref<8x32xf32, #tpu.memory_space<vmem>>, %arg2: memref<32x128xf32, #tpu.memory_space<vmem>>, %arg3: memref<1x128xf32, #tpu.memory_space<vmem>>, %arg4: memref<8x128xf32, #tpu.memory_space<vmem>>) attributes {dimension_semantics = [#tpu.dimension_semantics<parallel>], iteration_bounds = array<i64: 1>, scalar_prefetch = 0 : i64, scratch_operands = 0 : i64, tpu.core_type = #tpu.core_type<tc>, window_params = [{transform_indices = @transform_0, window_bounds = array<i64: 8, 32>}, {pipeline_mode = #tpu.pipeline_mode<synchronous>, transform_indices = @transform_1, window_bounds = array<i64: 32, 128>}, {pipeline_mode = #tpu.pipeline_mode<synchronous>, transform_indices = @transform_2, window_bounds = array<i64: 1, 128>}, {transform_indices = @transform_3, window_bounds = array<i64: 8, 128>}]} {
    %c0 = arith.constant 0 : index
    %c0_0 = arith.constant 0 : index
    %0 = vector.load %arg1[%c0, %c0_0] : memref<8x32xf32, #tpu.memory_space<vmem>>, vector<8x32xf32>
    %c0_1 = arith.constant 0 : index
    %c0_2 = arith.constant 0 : index
    %1 = vector.load %arg2[%c0_1, %c0_2] : memref<32x128xf32, #tpu.memory_space<vmem>>, vector<32x128xf32>
    %cst = arith.constant dense<0.000000e+00> : vector<8x128xf32>
    %2 = tpu.matmul %0, %1, %cst {dimension_numbers = #tpu.dot_dimension_numbers<[1], [0], [0], [1], [0, 0, 1, 1], [], []>} : vector<8x32xf32>, vector<32x128xf32>, vector<8x128xf32> -> vector<8x128xf32>
    %c0_3 = arith.constant 0 : index
    %c0_4 = arith.constant 0 : index
    %3 = vector.load %arg3[%c0_3, %c0_4] : memref<1x128xf32, #tpu.memory_space<vmem>>, vector<1x128xf32>
    %4 = vector.broadcast %3 : vector<1x128xf32> to vector<8x128xf32>
    %5 = arith.addf %2, %4 : vector<8x128xf32>
    %cst_5 = arith.constant dense<0xFF800000> : vector<8xf32>
    %6 = vector.multi_reduction <maximumf>, %5, %cst_5 [1] : vector<8x128xf32> to vector<8xf32>
    %7 = vector.shape_cast %6 : vector<8xf32> to vector<8x1xf32>
    %8 = vector.broadcast %7 : vector<8x1xf32> to vector<8x128xf32>
    %9 = arith.subf %5, %8 : vector<8x128xf32>
    %10 = math.exp %9 : vector<8x128xf32>
    %cst_6 = arith.constant dense<0.000000e+00> : vector<8xf32>
    %11 = vector.multi_reduction <add>, %10, %cst_6 [1] : vector<8x128xf32> to vector<8xf32>
    %12 = vector.shape_cast %11 : vector<8xf32> to vector<8x1xf32>
    %13 = vector.broadcast %12 : vector<8x1xf32> to vector<8x128xf32>
    %14 = arith.divf %10, %13 : vector<8x128xf32>
    %c0_7 = arith.constant 0 : index
    %c0_8 = arith.constant 0 : index
    %15 = vector.load %arg4[%c0_7, %c0_8] : memref<8x128xf32, #tpu.memory_space<vmem>>, vector<8x128xf32>
    tpu.vector_store %arg4[%c0_7, %c0_8], %14 {strides = array<i32>} : memref<8x128xf32, #tpu.memory_space<vmem>>, vector<8x128xf32>,
    return
  }
  func.func @transform_0(%arg0: i32) -> (i32, i32) {
    %c0_i32 = arith.constant 0 : i32
    %c0_i32_0 = arith.constant 0 : i32
    return %arg0, %c0_i32 : i32, i32
  }
  func.func @transform_1(%arg0: i32) -> (i32, i32) {
    %c0_i32 = arith.constant 0 : i32
    %c0_i32_0 = arith.constant 0 : i32
    %c0_i32_1 = arith.constant 0 : i32
    return %c0_i32, %c0_i32_0 : i32, i32
  }
  func.func @transform_2(%arg0: i32) -> (i32, i32) {
    %c0_i32 = arith.constant 0 : i32
    %c0_i32_0 = arith.constant 0 : i32
    %c0_i32_1 = arith.constant 0 : i32
    return %c0_i32, %c0_i32_0 : i32, i32
  }
  func.func @transform_3(%arg0: i32) -> (i32, i32) {
    %c0_i32 = arith.constant 0 : i32
    %c0_i32_0 = arith.constant 0 : i32
    return %arg0, %c0_i32 : i32, i32
  }
}

</mosaic_0001>

<bundles_post_ra>
// kernel: tpu_custom_call.1
= control target key start
LH: loop header
LB: loop body
LE: loop exit
PB: predicated region body
PF: predicated region fallthrough
CT: control target
= control target key end

     0   :  { %8 = vsyncpa [#allocation3], 0  ;;  %s342_s0 = inlined_call_operand.hbm [shape: f32[2,32], index: 0, kind: input, shape index: {}]   ;;  %s343_s1 = inlined_call_operand.hbm [shape: f32[32,128], index: 1, kind: input, shape index: {}]   ;;  %s344_s2 = inlined_call_operand.vmem [shape: f32[1,128], index: 2, kind: input, shape index: {}]   ;;  %s345_s3 = inlined_call_operand.hbm [shape: f32[2,128], index: 3, kind: output, shape index: {}]  }
   0x1   :  { %9 = vsyncpa [#allocation6], 0 }
   0x2   :  { %10 = vsyncpa [#allocation4], 0 }
   0x3   :  { %15 = vsyncadd [#allocation3], 96  ;;  %s267_s12 = smov [#allocation2]   ;;  %s195_s16 = scalar_lea.hbm %s342_s0, 32 }
   0x4   :  { %s16_s13 = sshll.u32 %s267_s12, 4  ;;  %p196_p0 = scmp.ne.s32.totalorder %s342_s0, %s195_s16  ;;  %s17_s13 = int_to_ptr.vmem [resolvable:$true] %s16_s13 }
   0x5   :  { %p199_p1 = scmp.lt.u32.totalorder %s195_s16, %s342_s0 }
   0x7   :  { %p201_p2 = pnand %p199_p1, %p196_p0 }
   0x9   :  { %204 = shalt.err (!%p201_p2)
}
   0xa   :  { %s205_s21 = scalar_lea.vmem %s17_s13, 32  ;;  %s209_s22 = scalar_lea.vmem %s17_s13, 128 }
   0xb   :  { %p206_p3 = scmp.ne.s32.totalorder %s17_s13, %s205_s21  ;;  %p210_p4 = scmp.lt.s32.totalorder %s17_s13, %s17_s13 }
   0xc   :  { %p211_p5 = scmp.lt.s32.totalorder %s209_s22, %s205_s21 }
   0xe   :  { %p212_p6 = por %p211_p5, %p210_p4 }
  0x10   :  { %p213_p7 = pnand %p212_p6, %p206_p3 }
  0x12   :  { %216 = shalt.err (!%p213_p7)
}
  0x13   :  { %s268_s23 = smov 32   ;;  %s269_s24 = smov 2  }
  0x14   :  { %22 = dma.hbm_to_vmem [thread:$0]  %s342_s0, 32, %s17_s13, [#allocation3], %s268_s23, %s268_s23, %s269_s24  }
  0x15   :  { %s270_s27 = smov [#allocation5]   ;;  %s217_s4 = scalar_lea.hbm %s343_s1, 512 }
  0x16   :  { %s28_s28 = sshll.u32 %s270_s27, 4  ;;  %p218_p8 = scmp.ne.s32.totalorder %s343_s1, %s217_s4  ;;  %s29_s28 = int_to_ptr.vmem [resolvable:$true] %s28_s28 }
  0x17   :  { %p221_p9 = scmp.lt.u32.totalorder %s217_s4, %s343_s1 }
  0x19   :  { %p223_p10 = pnand %p221_p9, %p218_p8 }
  0x1b   :  { %226 = shalt.err (!%p223_p10)
}
  0x1c   :  { %s227_s9 = scalar_lea.vmem %s29_s28, 512  ;;  %p232_p12 = scmp.lt.s32.totalorder %s29_s28, %s29_s28 }
  0x1d   :  { %p228_p11 = scmp.ne.s32.totalorder %s29_s28, %s227_s9  ;;  %p233_p13 = scmp.lt.s32.totalorder %s227_s9, %s227_s9 }
  0x1f   :  { %p234_p0 = por %p233_p13, %p232_p12 }
  0x21   :  { %p235_p1 = pnand %p234_p0, %p228_p11 }
  0x23   :  { %238 = shalt.err (!%p235_p1)
}
  0x24   :  { %s271_s0 = smov 128   ;;  %s272_s10 = smov 8  }
  0x25   :  { %34 = dma.hbm_to_vmem [thread:$0]  %s343_s1, 512, %s29_s28, [#allocation6], %s271_s0, %s271_s0, %s272_s10  }
  0x26   :  { %261 = dma.done.wait [#allocation3], 128  }
  0x27   :  { %262 = vsyncadd [#allocation3], 4294967168 }
  0x28   :  { %263 = dma.done.wait [#allocation6], 512  }
  0x29   :  { %264 = vsyncadd [#allocation6], 4294966784  ;;  %v273_v0 = vmov 0.0|0.0   ;;  %vm274_vm0 = vmmov 0   ;;  %v275_v1 = vmov 0.0   ;;  %v44_v2 = vld [vmem:[#allocation5] sm:$0xff] }
  0x2a   :  { %175 = vmatprep.subr.bf16.mxu0 %v273_v0  ;;  %172 = vmatprep.mubr.msk.f32.mxu0 %vm274_vm0, %v275_v1  ;;  %v45_v3 = vld [vmem:[#allocation5 + $0x8] sm:$0xff]  ;;  %v46_v4 = vld [vmem:[#allocation5 + $0x10] sm:$0xff]  ;;  %v47_v6 = vld [vmem:[#allocation5 + $0x18] sm:$0xff]  ;;  %vm55_vm1 = vcmask 261120  }
  0x2b   :  { %v176_v5 = vpack.c.bf16 %v45_v3, %v44_v2  ;;  %v179_v7 = vpack.c.bf16 %v47_v6, %v46_v4  ;;  %v43_v8 = vld [vmem:[#allocation2] sm:$0xff] }
  0x2c   :  { %v157_v9 = vld [vmem:[%s344_s2] ss:$0 sm:$0xff] }
  0x2d   :  { %177 = vmatpush3.bf16.msra.mxu0 %v176_v5 }
  0x2e   :  { %178 = vmatprep.subr.bf16.mxu0 %v273_v0 }
  0x31   :  { %180 = vmatpush3.bf16.msra.mxu0 %v179_v7 }
  0x34   :  { %173 = vmatmul.mubr.msk.f32.vlgmr.msra.gmra.mrb[0].mxu0 %vm55_vm1, %v43_v8 }
 0x107   :  { %v125_v10 = vpop.f32.mrb[0].mxu0 }
 0x108   :  { %v126_v11 = vadd.f32 %v157_v9, %v125_v10  ;;  %v174_v12 = vpop.f32.mrb[1].mxu0 }
 0x10a   :  { %129 = vmax.xlane.f32.xlu0 %v126_v11 }
 0x197   :  { %v130_v13 = vpop.xlane.xlu0 %129 }
 0x198   :  { %v131_v14 = vsub.f32 %v126_v11, %v130_v13 }
 0x19a   :  { %v132_v15 = vmul.f32 1.442695, %v131_v14 }
 0x19c   :  { %191 = vpow2.f32 %v132_v15 }
 0x1a6   :  { %v192_v16 = vpop.eup %191 }
 0x1a7   :  { %134 = vadd.xlane.f32.xlu0 %v192_v16 }
 0x234   :  { %v135_v17 = vpop.xlane.xlu0 %134 }
 0x235   :  { %193 = vrcp.f32 %v135_v17 }
 0x23f   :  { %v194_v18 = vpop.eup %193 }
 0x240   :  { %v137_v19 = vmul.f32 %v194_v18, %v192_v16 }
 0x242   :  { %138 = vst [vmem:[#allocation7] sm:$0xff] %v137_v19 }
 0x243   :  { %143 = vsyncadd [#allocation4], 96  ;;  %s276_s14 = smov [#allocation7]  }
 0x244   :  { %s144_s15 = sshll.u32 %s276_s14, 4  ;;  %s145_s15 = int_to_ptr.vmem [resolvable:$true] %s144_s15 }
 0x245   :  { %s239_s2 = scalar_lea.vmem %s145_s15, 32  ;;  %s243_s16 = scalar_lea.vmem %s145_s15, 128 }
 0x246   :  { %p240_p2 = scmp.ne.s32.totalorder %s145_s15, %s239_s2  ;;  %p244_p3 = scmp.lt.s32.totalorder %s145_s15, %s145_s15 }
 0x247   :  { %p245_p4 = scmp.lt.s32.totalorder %s243_s16, %s239_s2 }
 0x249   :  { %p246_p5 = por %p245_p4, %p244_p3 }
 0x24b   :  { %p247_p6 = pnand %p246_p5, %p240_p2 }
 0x24d   :  { %250 = shalt.err (!%p247_p6)
}
 0x24e   :  { %s251_s19 = scalar_lea.hbm %s345_s3, 32 }
 0x24f   :  { %p252_p7 = scmp.ne.s32.totalorder %s345_s3, %s251_s19  ;;  %p255_p8 = scmp.lt.u32.totalorder %s251_s19, %s345_s3 }
 0x251   :  { %p257_p9 = pnand %p255_p8, %p252_p7 }
 0x253   :  { %260 = shalt.err (!%p257_p9)
}
 0x254   :  { %150 = dma.vmem_to_hbm [thread:$0]  %s145_s15, 32, %s345_s3, [#allocation4], %s268_s23, %s268_s23, %s269_s24  }
 0x255   :  { %265 = dma.done.wait [#allocation4], 128  }
 0x256   :  { %266 = vsyncadd [#allocation4], 4294967168 }
 0x257   :  { %154 = vsyncpa [#allocation3], 1 }
 0x258   :  { %155 = vsyncpa [#allocation6], 1 }
 0x259   :  { %156 = vsyncpa [#allocation4], 1 }

</bundles_post_ra>
